<compile_context>
chip_gen: v6e
topology: v6e:2x2x1
jax: 0.10.0
libtpu: 0.0.40
codegen_flags: <defaults>
</compile_context>

<pallas_src>
import functools

import jax
import jax.numpy as jnp
from jax import lax
from jax.experimental import pallas as pl
from jax.experimental.pallas import tpu as pltpu


def _round_up(x, mult):
    return ((x + mult - 1) // mult) * mult


def _device_kind():
    try:
        return jax.devices()[0].device_kind.lower()
    except Exception:
        return ""


def _default_num_splits(kind):
    # Dual-TensorCore chips: shard the M reduction across cores via a leading
    # "parallel" grid axis. Single-TC chips (v5e / v6e) keep one split.
    if "v7" in kind or "v4" in kind or "v5p" in kind:
        return 2
    return 1


def _tile_budget_and_vmem_limit(kind):
    """Per-generation x-tile byte budget and explicit scoped-VMEM limit."""
    if "v5e" in kind or "v5 lite" in kind or "v5lite" in kind:
        # 16 MiB scoped-VMEM default: 2 x 4 MiB double-buffered tiles fit.
        return 4 << 20, None
    if "v7" in kind:
        # 64 MiB physical VMEM per TC: 2 x 10 MiB tiles + resident weights.
        return 10 << 20, 48 << 20
    if "v6" in kind:
        # 128 MiB physical VMEM: loosest budget of the three generations.
        return 14 << 20, 64 << 20
    # Unknown chip: stay conservative.
    return 4 << 20, None


def _global_kernel_body(x_ref, w_ref, scale_ref, out_ref, acc_ref, *,
                        tile_m, steps_per_split, m_total, needs_mask):
    """One grid step over the M (lane) axis within one split.

    x_ref:     (N, tile_m)    current x tile (native dtype, double-buffered)
    w_ref:     (N, K2_pad)    conv kernel, lane-padded to 128, f32 (resident)
    scale_ref: (1,) SMEM      dot_scale / M (supports traced dot_scale)
    out_ref:   (1, 1, K2_pad) this split's output row (resident over M axis)
    acc_ref:   (N, 1)         running per-row sum scratch (f32)
    """
    mi = pl.program_id(1)

    @pl.when(mi == 0)
    def _init():
        acc_ref[...] = jnp.zeros_like(acc_ref)

    # Read native dtype, accumulate in f32 (VPU cast, hidden under the DMA).
    x = x_ref[...].astype(jnp.float32)
    if needs_mask:
        # Mask lanes past the true M extent (partial last tile and any
        # fully-OOB tiles whose block index was clamped in the index_map).
        tile_idx = pl.program_id(0) * steps_per_split + mi
        start = tile_idx * tile_m
        lane = lax.broadcasted_iota(jnp.int32, x.shape, 1)
        x = jnp.where(lane + start < m_total, x, 0.0)

    # Lane reduce (XLU) + add (VPU). No transpose, no MXU.
    acc_ref[...] += jnp.sum(x, axis=1, keepdims=True)

    @pl.when(mi == pl.num_programs(1) - 1)
    def _finalize():
        rowsum = acc_ref[...]                            # (N, 1)
        weighted = rowsum * w_ref[...]                   # (N, K2_pad) lane-broadcast mul
        gk = jnp.sum(weighted, axis=0, keepdims=True)    # (1, K2_pad) sublane reduce
        out_ref[...] = (gk * scale_ref[0])[None]         # (1, 1, K2_pad) lane-dense store


def global_kernel_forward(x, conv_kernel, gk_size, dot_scale, *,
                          tile_m=None, num_splits=None):
    """Pallas implementation of GlobalKernel.forward.

    Args:
      x:           (n_kernel, M) array (f32 or bf16; read in native dtype)
      conv_kernel: (n_kernel, gk_size**2) array
      dot_scale:   Python scalar or traced JAX scalar
      tile_m:      optional M-axis tile override (multiple of 128 or == M)
      num_splits:  optional override of the TensorCore split count
    Returns:
      (1, 1, gk_size, gk_size) float32
    """
    n_kernel, m = x.shape
    k2 = gk_size * gk_size
    assert conv_kernel.shape == (n_kernel, k2)

    kind = _device_kind()
    if num_splits is None:
        num_splits = _default_num_splits(kind)
    budget_bytes, vmem_limit = _tile_budget_and_vmem_limit(kind)

    itemsize = jnp.dtype(x.dtype).itemsize

    # ---- x tile over the M (lane) axis (no wrapper-side padding) -----------
    if tile_m is None:
        if num_splits == 1 and n_kernel * m * itemsize <= budget_bytes:
            tile_m = m                       # single full-extent tile
        else:
            budget_cols = max(
                128, (budget_bytes // (itemsize * n_kernel)) // 128 * 128)
            want_cols = _round_up(pl.cdiv(m, num_splits), 128)
            tile_m = max(128, min(budget_cols, want_cols))
            if tile_m >= m:                  # degenerate small-M case
                tile_m = m

    num_m = pl.cdiv(m, tile_m)
    num_splits = max(1, min(num_splits, num_m))
    steps_per_split = pl.cdiv(num_m, num_splits)

    # ---- lane-dense weights / output ----------------------------------------
    k2_pad = _round_up(k2, 128)
    w = jnp.pad(conv_kernel.astype(jnp.float32), ((0, 0), (0, k2_pad - k2)))

    # dot_scale may be a traced/learned scalar: fold the mean's 1/M and ship
    # it through SMEM instead of baking a Python float into the trace.
    scale = (jnp.asarray(dot_scale, dtype=jnp.float32) / jnp.float32(m)).reshape(1)

    # VMEM sanity check (review item: huge n_kernel with the 128-col floor).
    limit = vmem_limit if vmem_limit is not None else (16 << 20)
    working = 2 * n_kernel * tile_m * itemsize + 2 * n_kernel * k2_pad * 4 + (1 << 20)
    if working > limit:
        # TODO(synk): add n_kernel-axis tiling for very large hidden dims.
        raise ValueError(
            f"GlobalKernel working set ({working} B) exceeds VMEM budget "
            f"({limit} B) for n_kernel={n_kernel}, tile_m={tile_m}.")

    needs_mask = (m % tile_m != 0) or (num_splits * steps_per_split != num_m)

    if num_splits * steps_per_split == num_m:
        x_index = lambda s, mi: (0, s * steps_per_split + mi)
    else:
        last_blk = num_m - 1
        # Clamp fully-OOB logical tiles onto the last real tile; the kernel
        # masks them to zero, so the duplicate read contributes nothing.
        x_index = lambda s, mi: (0, jnp.minimum(s * steps_per_split + mi, last_blk))

    kernel = functools.partial(
        _global_kernel_body,
        tile_m=tile_m,
        steps_per_split=steps_per_split,
        m_total=m,
        needs_mask=needs_mask,
    )

    cost = pl.CostEstimate(
        flops=2 * n_kernel * m + 2 * n_kernel * k2_pad,
        transcendentals=0,
        bytes_accessed=(n_kernel * m * itemsize + n_kernel * k2_pad * 4
                        + num_splits * k2_pad * 4 + 4),
    )

    compiler_kwargs = dict(dimension_semantics=("parallel", "arbitrary"))
    if vmem_limit is not None:
        compiler_kwargs["vmem_limit_bytes"] = int(vmem_limit)

    gk_rows = pl.pallas_call(
        kernel,
        out_shape=jax.ShapeDtypeStruct((num_splits, 1, k2_pad), jnp.float32),
        grid_spec=pltpu.PrefetchScalarGridSpec(
            num_scalar_prefetch=0,
            grid=(num_splits, steps_per_split),
            in_specs=[
                # x tile marches along M within each split (native dtype).
                pl.BlockSpec((n_kernel, tile_m), x_index),
                # Weights stay resident (same block every step -> DMA'd once).
                pl.BlockSpec((n_kernel, k2_pad), lambda s, mi: (0, 0)),
                # Folded (dot_scale / M) scalar lives in SMEM.
                pl.BlockSpec(memory_space=pltpu.MemorySpace.SMEM),
            ],
            # Each split owns one output row, resident across the M axis and
            # written only at that split's last grid step.
            out_specs=pl.BlockSpec((1, 1, k2_pad), lambda s, mi: (s, 0, 0)),
            scratch_shapes=[pltpu.VMEM((n_kernel, 1), jnp.float32)],
        ),
        compiler_params=pltpu.CompilerParams(**compiler_kwargs),
        cost_estimate=cost,
    )(x, w, scale)

    gk = jnp.sum(gk_rows[:, 0, :k2], axis=0)       # combine per-core partials
    return gk.reshape(1, 1, gk_size, gk_size)


def init_conv_kernel(key, n_kernel, gk_size, std=0.1):
    """Deterministic trunc_normal_(0, 0.1) equivalent (truncated at +/- 2*std)."""
    k2 = gk_size * gk_size
    w = jax.random.truncated_normal(key, -2.0, 2.0, (n_kernel, k2), jnp.float32)
    return w * std


if __name__ == "__main__":
    def _ref(x, w, gk_size, dot_scale):
        avg = jnp.mean(x.astype(jnp.float32), axis=1).reshape(1, -1)
        return (avg @ w.astype(jnp.float32) * dot_scale).reshape(
            1, 1, gk_size, gk_size)

    key = jax.random.PRNGKey(0)
    k1, k2_, k3, k4, k5 = jax.random.split(key, 5)

    gk_size = 3
    dot_scale = 0.1

    # Case 1: small f32 input -> single full-extent tile; also run under jit
    # with a traced dot_scale to exercise the SMEM-scalar path.
    n_kernel, n_items = 32, 64
    x = jax.random.normal(k1, (n_kernel, n_items), jnp.float32)
    w = init_conv_kernel(k2_, n_kernel, gk_size)
    ref1 = _ref(x, w, gk_size, dot_scale)
    gk = jax.block_until_ready(global_kernel_forward(x, w, gk_size, dot_scale))
    assert gk.shape == (1, 1, gk_size, gk_size)
    assert jnp.allclose(gk, ref1, atol=1e-5, rtol=1e-5)

    jitted = jax.jit(lambda xx, ww, ds: global_kernel_forward(xx, ww, gk_size, ds))
    gk_j = jax.block_until_ready(jitted(x, w, jnp.float32(dot_scale)))
    assert jnp.allclose(gk_j, ref1, atol=1e-5, rtol=1e-5)

    # Case 2: tiled + forced 2-way split (accumulator across grid steps,
    # clamped index map, masked OOB tiles, per-split output rows).  The
    # "parallel" axis simply runs serially on single-TC chips, so this path
    # is valid on every TPU generation.
    n_kernel2, n_items2 = 48, 320
    x2 = jax.random.normal(k3, (n_kernel2, n_items2), jnp.float32)
    w2 = init_conv_kernel(k4, n_kernel2, gk_size)
    gk2 = jax.block_until_ready(
        global_kernel_forward(x2, w2, gk_size, dot_scale, tile_m=128, num_splits=2))
    assert gk2.shape == (1, 1, gk_size, gk_size)
    assert jnp.allclose(gk2, _ref(x2, w2, gk_size, dot_scale), atol=1e-5, rtol=1e-5)

    # Case 3: bf16 input read in native dtype with a partial last tile
    # (no wrapper-side pad / astype of x).
    n_kernel3, n_items3 = 32, 200
    x3 = jax.random.normal(k5, (n_kernel3, n_items3), jnp.float32).astype(jnp.bfloat16)
    w3 = init_conv_kernel(k2_, n_kernel3, gk_size)
    gk3 = jax.block_until_ready(
        global_kernel_forward(x3, w3, gk_size, dot_scale, tile_m=128, num_splits=1))
    assert jnp.allclose(gk3, _ref(x3, w3, gk_size, dot_scale), atol=1e-4, rtol=1e-4)

    print("KERNEL_OK")
</pallas_src>

<mosaic_0001>
module attributes {stable_mosaic.version = 11 : i64} {
  func.func @_global_kernel_body(%arg0: i32, %arg1: i32, %arg2: memref<32x64xf32, #tpu.memory_space<vmem>>, %arg3: memref<32x128xf32, #tpu.memory_space<vmem>>, %arg4: memref<1xf32, #tpu.memory_space<smem>>, %arg5: memref<1x1x128xf32, #tpu.memory_space<vmem>>, %arg6: memref<32x1xf32, #tpu.memory_space<vmem>>) attributes {dimension_semantics = [#tpu.dimension_semantics<parallel>, #tpu.dimension_semantics<arbitrary>], iteration_bounds = array<i64: 1, 1>, scalar_prefetch = 0 : i64, scratch_operands = 1 : i64, tpu.core_type = #tpu.core_type<tc>, window_params = [{transform_indices = @transform_0, window_bounds = array<i64: 32, 64>}, {pipeline_mode = #tpu.pipeline_mode<synchronous>, transform_indices = @transform_1, window_bounds = array<i64: 32, 128>}, {transform_indices = @transform_2, window_bounds = array<i64: 1>}, {transform_indices = @transform_3, window_bounds = array<i64: 1, 1, 128>}]} {
    %c0_i32 = arith.constant 0 : i32
    %0 = arith.cmpi eq, %arg1, %c0_i32 : i32
    %1 = arith.extui %0 : i1 to i32
    %c0_i32_0 = arith.constant 0 : i32
    %2 = arith.cmpi ne, %1, %c0_i32_0 : i32
    scf.if %2 {
      %cst_8 = arith.constant 0.000000e+00 : f32
      %12 = vector.broadcast %cst_8 : f32 to vector<32x1xf32>
      %c0_9 = arith.constant 0 : index
      %c0_10 = arith.constant 0 : index
      %13 = vector.load %arg6[%c0_9, %c0_10] : memref<32x1xf32, #tpu.memory_space<vmem>>, vector<32x1xf32>
      tpu.vector_store %arg6[%c0_9, %c0_10], %12 {strides = array<i32>} : memref<32x1xf32, #tpu.memory_space<vmem>>, vector<32x1xf32>,
    } else {
    }
    %c0 = arith.constant 0 : index
    %c0_1 = arith.constant 0 : index
    %3 = vector.load %arg2[%c0, %c0_1] : memref<32x64xf32, #tpu.memory_space<vmem>>, vector<32x64xf32>
    %c0_2 = arith.constant 0 : index
    %c0_3 = arith.constant 0 : index
    %4 = vector.load %arg6[%c0_2, %c0_3] : memref<32x1xf32, #tpu.memory_space<vmem>>, vector<32x1xf32>
    %cst = arith.constant dense<0.000000e+00> : vector<32xf32>
    %5 = vector.multi_reduction <add>, %3, %cst [1] : vector<32x64xf32> to vector<32xf32>
    %6 = vector.shape_cast %5 : vector<32xf32> to vector<32x1xf32>
    %7 = arith.addf %4, %6 : vector<32x1xf32>
    %c0_4 = arith.constant 0 : index
    %c0_5 = arith.constant 0 : index
    %8 = vector.load %arg6[%c0_4, %c0_5] : memref<32x1xf32, #tpu.memory_space<vmem>>, vector<32x1xf32>
    tpu.vector_store %arg6[%c0_4, %c0_5], %7 {strides = array<i32>} : memref<32x1xf32, #tpu.memory_space<vmem>>, vector<32x1xf32>,
    %c0_i32_6 = arith.constant 0 : i32
    %9 = arith.cmpi eq, %arg1, %c0_i32_6 : i32
    %10 = arith.extui %9 : i1 to i32
    %c0_i32_7 = arith.constant 0 : i32
    %11 = arith.cmpi ne, %10, %c0_i32_7 : i32
    scf.if %11 {
      %c0_8 = arith.constant 0 : index
      %c0_9 = arith.constant 0 : index
      %12 = vector.load %arg6[%c0_8, %c0_9] : memref<32x1xf32, #tpu.memory_space<vmem>>, vector<32x1xf32>
      %c0_10 = arith.constant 0 : index
      %c0_11 = arith.constant 0 : index
      %13 = vector.load %arg3[%c0_10, %c0_11] : memref<32x128xf32, #tpu.memory_space<vmem>>, vector<32x128xf32>
      %14 = vector.broadcast %12 : vector<32x1xf32> to vector<32x128xf32>
      %15 = arith.mulf %14, %13 : vector<32x128xf32>
      %cst_12 = arith.constant dense<0.000000e+00> : vector<128xf32>
      %16 = vector.multi_reduction <add>, %15, %cst_12 [0] : vector<32x128xf32> to vector<128xf32>
      %17 = vector.shape_cast %16 : vector<128xf32> to vector<1x128xf32>
      %c0_13 = arith.constant 0 : index
      %18 = memref.load %arg4[%c0_13] : memref<1xf32, #tpu.memory_space<smem>>
      %19 = vector.broadcast %18 : f32 to vector<1x128xf32>
      %20 = arith.mulf %17, %19 : vector<1x128xf32>
      %21 = vector.shape_cast %20 : vector<1x128xf32> to vector<1x1x128xf32>
      %c0_14 = arith.constant 0 : index
      %c0_15 = arith.constant 0 : index
      %c0_16 = arith.constant 0 : index
      %22 = vector.load %arg5[%c0_14, %c0_15, %c0_16] : memref<1x1x128xf32, #tpu.memory_space<vmem>>, vector<1x1x128xf32>
      tpu.vector_store %arg5[%c0_14, %c0_15, %c0_16], %21 {strides = array<i32>} : memref<1x1x128xf32, #tpu.memory_space<vmem>>, vector<1x1x128xf32>,
    } else {
    }
    return
  }
  func.func @transform_0(%arg0: i32, %arg1: i32) -> (i32, i32) {
    %c1_i32 = arith.constant 1 : i32
    %0 = arith.muli %arg0, %c1_i32 : i32
    %1 = arith.addi %0, %arg1 : i32
    %c0_i32 = arith.constant 0 : i32
    %c0_i32_0 = arith.constant 0 : i32
    return %c0_i32, %1 : i32, i32
  }
  func.func @transform_1(%arg0: i32, %arg1: i32) -> (i32, i32) {
    %c0_i32 = arith.constant 0 : i32
    %c0_i32_0 = arith.constant 0 : i32
    %c0_i32_1 = arith.constant 0 : i32
    return %c0_i32, %c0_i32_0 : i32, i32
  }
  func.func @transform_2(%arg0: i32, %arg1: i32) -> i32 {
    %c0_i32 = arith.constant 0 : i32
    %c0_i32_0 = arith.constant 0 : i32
    return %c0_i32 : i32
  }
  func.func @transform_3(%arg0: i32, %arg1: i32) -> (i32, i32, i32) {
    %c0_i32 = arith.constant 0 : i32
    %c0_i32_0 = arith.constant 0 : i32
    %c0_i32_1 = arith.constant 0 : i32
    return %arg0, %c0_i32, %c0_i32_0 : i32, i32, i32
  }
}

</mosaic_0001>

<bundles_post_ra>
// kernel: tpu_custom_call.1
= control target key start
LH: loop header
LB: loop body
LE: loop exit
PB: predicated region body
PF: predicated region fallthrough
CT: control target
= control target key end

     0   :  { %9 = vsyncpa [#allocation5], 0  ;;  %s273_s0 = inlined_call_operand.hbm [shape: f32[32,64], index: 0, kind: input, shape index: {}]   ;;  %s274_s1 = inlined_call_operand.hbm [shape: f32[32,128], index: 1, kind: input, shape index: {}]   ;;  %s275_s2 = inlined_call_operand.<no memory space> [shape: f32[1], index: 2, kind: input, shape index: {}]   ;;  %s276_s3 = inlined_call_operand.hbm [shape: f32[1,1,128], index: 3, kind: output, shape index: {}]  }
   0x1   :  { %10 = vsyncpa [#allocation8], 0 }
   0x2   :  { %11 = vsyncpa [#allocation6], 0  ;;  %s226_s12 = smov [#allocation4]  }
   0x3   :  { %s20_s13 = sshll.u32 %s226_s12, 4  ;;  %s21_s13 = int_to_ptr.vmem [resolvable:$true] %s20_s13 }
   0x4   :  { %s168_s14 = scalar_lea.vmem %s21_s13, 512  ;;  %p173_p1 = scmp.lt.s32.totalorder %s21_s13, %s21_s13 }
   0x5   :  { %p169_p0 = scmp.ne.s32.totalorder %s21_s13, %s168_s14  ;;  %p174_p2 = scmp.lt.s32.totalorder %s168_s14, %s168_s14 }
   0x7   :  { %p175_p3 = por %p174_p2, %p173_p1 }
   0x9   :  { %p176_p4 = pnand %p175_p3, %p169_p0 }
   0xb   :  { %179 = shalt.err (!%p176_p4)
}
   0xc   :  { %s227_s15 = smov 128   ;;  %s228_s16 = smov 8  }
   0xd   :  { %26 = dma.hbm_to_vmem [thread:$0]  %s273_s0, 512, %s21_s13, [#allocation5], %s227_s15, %s227_s15, %s228_s16  }
   0xe   :  { %s229_s19 = smov [#allocation7]  }
   0xf   :  { %s32_s20 = sshll.u32 %s229_s19, 4  ;;  %s33_s20 = int_to_ptr.vmem [resolvable:$true] %s32_s20 }
  0x10   :  { %s188_s21 = scalar_lea.vmem %s33_s20, 512  ;;  %p193_p6 = scmp.lt.s32.totalorder %s33_s20, %s33_s20 }
  0x11   :  { %p189_p5 = scmp.ne.s32.totalorder %s33_s20, %s188_s21  ;;  %p194_p7 = scmp.lt.s32.totalorder %s188_s21, %s188_s21 }
  0x13   :  { %p195_p8 = por %p194_p7, %p193_p6 }
  0x15   :  { %p196_p9 = pnand %p195_p8, %p189_p5 }
  0x17   :  { %199 = shalt.err (!%p196_p9)
}
  0x18   :  { %38 = dma.hbm_to_vmem [thread:$0]  %s274_s1, 512, %s33_s20, [#allocation8], %s227_s15, %s227_s15, %s228_s16  }
  0x19   :  { %220 = dma.done.wait [#allocation5], 512  }
  0x1a   :  { %221 = vsyncadd [#allocation5], 4294966784 }
  0x1b   :  { %222 = dma.done.wait [#allocation8], 512  }
  0x1c   :  { %223 = vsyncadd [#allocation8], 4294966784  ;;  %vm52_vm0 = vcmask 7168   ;;  %v230_v0 = vmov 0.0   ;;  %vm65_vm1 = vcmask 523264   ;;  %v57_v1 = vld [vmem:[#allocation4] sm:$0xff]  ;;  %v132_v46 = vstv %s275_s2 }
  0x1d   :  { %53 = vst.msk [vmem:[#allocation2] sm:$0xff] %vm52_vm0, %v230_v0  ;;  %54 = vst.msk [vmem:[#allocation2 + $0x8] sm:$0xff] %vm52_vm0, %v230_v0  ;;  %v58_v2 = vld [vmem:[#allocation4 + $0x8] sm:$0xff]  ;;  %v59_v3 = vld [vmem:[#allocation4 + $0x10] sm:$0xff]  ;;  %v66_v4 = vsel %vm65_vm1, %v57_v1, 0.0  ;;  %v231_v9 = vmov 0  }
  0x1e   :  { %55 = vst.msk [vmem:[#allocation2 + $0x10] sm:$0xff] %vm52_vm0, %v230_v0  ;;  %56 = vst.msk [vmem:[#allocation2 + $0x18] sm:$0xff] %vm52_vm0, %v230_v0  ;;  %v72_v5 = vsel %vm65_vm1, %v59_v3, 0.0  ;;  %v60_v6 = vld [vmem:[#allocation4 + $0x18] sm:$0xff]  ;;  %67 = vadd.xlane.f32.xlu0 %v66_v4  ;;  %v69_v7 = vsel %vm65_vm1, %v58_v2, 0.0  ;;  %159 = vset.pattern.permute.xlu1 %v231_v9  ;;  %v95_v26 = vld [vmem:[#allocation7 + $0x8] sm:$0xff] }
  0x1f   :  { %73 = vadd.xlane.f32.xlu1 %v72_v5  ;;  %v75_v8 = vsel %vm65_vm1, %v60_v6, 0.0  ;;  %158 = vset.pattern.permute.xlu0 %v231_v9  ;;  %v94_v28 = vld [vmem:[#allocation7] sm:$0xff]  ;;  %v96_v30 = vld [vmem:[#allocation7 + $0x10] sm:$0xff]  ;;  %v97_v35 = vld [vmem:[#allocation7 + $0x18] sm:$0xff]  ;;  %s232_s24 = smov [#allocation9]  }
  0x20   :  { %s141_s25 = sshll.u32 %s232_s24, 4  ;;  %s142_s25 = int_to_ptr.vmem [resolvable:$true] %s141_s25 }
  0x21   :  { %s200_s26 = scalar_lea.vmem %s142_s25, 16  ;;  %s204_s27 = scalar_lea.vmem %s142_s25, 32 }
  0x22   :  { %70 = vadd.xlane.f32.xlu0 %v69_v7  ;;  %p201_p10 = scmp.ne.s32.totalorder %s142_s25, %s200_s26  ;;  %p205_p11 = scmp.lt.s32.totalorder %s142_s25, %s142_s25 }
  0x23   :  { %76 = vadd.xlane.f32.xlu1 %v75_v8  ;;  %p206_p12 = scmp.lt.s32.totalorder %s204_s27, %s200_s26 }
  0x24   :  { %v61_v10 = vld [vmem:[#allocation2] sm:$0xff]  ;;  %v62_v16 = vld [vmem:[#allocation2 + $0x8] sm:$0xff] }
  0x25   :  { %v63_v11 = vld [vmem:[#allocation2 + $0x10] sm:$0xff]  ;;  %v64_v17 = vld [vmem:[#allocation2 + $0x18] sm:$0xff]  ;;  %p207_p13 = por %p206_p12, %p205_p11 }
  0x27   :  { %p208_p0 = pnand %p207_p13, %p201_p10 }
  0xa7   :  { %v68_v12 = vpop.xlane.xlu0 %67 }
  0xa8   :  { %v74_v13 = vpop.xlane.xlu1 %73  ;;  %v78_v14 = vadd.f32 %v68_v12, %v61_v10 }
  0xa9   :  { %v80_v15 = vadd.f32 %v74_v13, %v63_v11 }
  0xaa   :  { %83 = vst.msk [vmem:[#allocation2] sm:$0xff] %vm52_vm0, %v78_v14 }
  0xab   :  { %85 = vst.msk [vmem:[#allocation2 + $0x10] sm:$0xff] %vm52_vm0, %v80_v15  ;;  %v71_v18 = vpop.xlane.xlu0 %70 }
  0xac   :  { %v77_v19 = vpop.xlane.xlu1 %76  ;;  %v79_v20 = vadd.f32 %v71_v18, %v62_v16 }
  0xad   :  { %v81_v21 = vadd.f32 %v77_v19, %v64_v17 }
  0xae   :  { %84 = vst.msk [vmem:[#allocation2 + $0x8] sm:$0xff] %vm52_vm0, %v79_v20 }
  0xaf   :  { %86 = vst.msk [vmem:[#allocation2 + $0x18] sm:$0xff] %vm52_vm0, %v81_v21 }
  0xb1   :  { %v90_v22 = vld [vmem:[#allocation2] sm:$0xff] }
  0xb2   :  { %100 = vperm.xlu0 %158, %v90_v22   ;;  %v92_v24 = vld [vmem:[#allocation2 + $0x10] sm:$0xff] }
  0xb5   :  { %v91_v23 = vld [vmem:[#allocation2 + $0x8] sm:$0xff] }
  0xb6   :  { %105 = vperm.xlu1 %159, %v91_v23   ;;  %v93_v25 = vld [vmem:[#allocation2 + $0x18] sm:$0xff] }
  0xba   :  { %110 = vperm.xlu1 %159, %v92_v24  }
  0xbe   :  { %115 = vperm.xlu1 %159, %v93_v25  }
 0x12d   :  { %v101_v29 = vpop.permute.xlu0 %100 }
 0x12e   :  { %v118_v33 = vmul.f32 %v101_v29, %v94_v28 }
 0x131   :  { %v106_v27 = vpop.permute.xlu1 %105 }
 0x132   :  { %v119_v31 = vmul.f32 %v106_v27, %v95_v26 }
 0x134   :  { %v122_v36 = vadd.f32 %v119_v31, %v118_v33 }
 0x135   :  { %v111_v32 = vpop.permute.xlu1 %110 }
 0x136   :  { %v120_v34 = vmul.f32 %v111_v32, %v96_v30 }
 0x138   :  { %v123_v38 = vadd.f32 %v122_v36, %v120_v34 }
 0x139   :  { %v116_v37 = vpop.permute.xlu1 %115 }
 0x13a   :  { %v121_v39 = vmul.f32 %v116_v37, %v97_v35 }
 0x13c   :  { %v124_v40 = vadd.f32 %v123_v38, %v121_v39 }
 0x13e   :  { %v125_v41 = vrot.slane %v124_v40, 4 }
 0x140   :  { %v126_v42 = vadd.f32 %v125_v41, %v124_v40 }
 0x142   :  { %v127_v43 = vrot.slane %v126_v42, 2 }
 0x144   :  { %v128_v44 = vadd.f32 %v127_v43, %v126_v42 }
 0x146   :  { %v129_v45 = vrot.slane %v128_v44, 1 }
 0x148   :  { %v130_v47 = vadd.f32 %v129_v45, %v128_v44 }
 0x14a   :  { %v133_v48 = vmul.f32 %v132_v46, %v130_v47 }
 0x14c   :  { %134 = vst [vmem:[#allocation9] sm:$0x1] %v133_v48 }
 0x14d   :  { %211 = shalt.err (!%p208_p0)
}
 0x14e   :  { %144 = dma.vmem_to_hbm [thread:$0]  %s142_s25, 16, %s276_s3, [#allocation6]  }
 0x14f   :  { %224 = dma.done.wait [#allocation6], 16  }
 0x150   :  { %225 = vsyncadd [#allocation6], 4294967280 }
 0x151   :  { %148 = vsyncpa [#allocation5], 1 }
 0x152   :  { %149 = vsyncpa [#allocation8], 1 }
 0x153   :  { %150 = vsyncpa [#allocation6], 1 }

</bundles_post_ra>
